<compile_context>
chip_gen: v5e
topology: v5e:2x2
jax: 0.10.0
libtpu: 0.0.40
codegen_flags: <defaults>
</compile_context>

<pallas_src>
import math
import jax
import jax.numpy as jnp
from jax.experimental import pallas as pl
from jax.experimental.pallas import tpu as pltpu

_SQRT_2_OVER_PI = math.sqrt(2.0 / math.pi)


def _gelu(x):
    # Tanh-approximation gelu, matching the PyTorch reference.  The tanh goes to the
    # EUP (its own issue slot); the polynomial stays on the VPU in f32.
    return 0.5 * x * (1.0 + jnp.tanh(_SQRT_2_OVER_PI * (x + 0.044715 * x * x * x)))


def _round_up(a, b):
    return (a + b - 1) // b * b


def _vmem_limit_bytes():
    """Per-generation scoped-VMEM limit (v7x: 64 MiB physical, v5e/v6e: 128 MiB)."""
    cap = 64 * 1024 * 1024
    try:
        info = pltpu.get_tpu_info()
        cap = int(getattr(info, "vmem_capacity_bytes", cap))
    except Exception:
        pass
    if cap <= 64 * 1024 * 1024:
        return 40 * 1024 * 1024      # v7x: stay well below the 64 MiB physical VMEM
    return 96 * 1024 * 1024          # v5e / v6e: 128 MiB physical


# ---------------------------------------------------------------------------
# Kernels
# ---------------------------------------------------------------------------

def _mlp_kernel_resident(x_ref, wfc_ref, bfc_ref, wproj_ref, bproj_ref, o_ref):
    """Weights are VMEM-resident (constant index maps); only x / out stream."""
    h = jnp.dot(x_ref[...], wfc_ref[...],
                preferred_element_type=jnp.float32) + bfc_ref[...]
    h = _gelu(h)
    out = jnp.dot(h.astype(wproj_ref.dtype), wproj_ref[...],
                  preferred_element_type=jnp.float32) + bproj_ref[...]
    o_ref[...] = out.astype(o_ref.dtype)


def _mlp_kernel_tiled(x_ref, wfc_ref, bfc_ref, wproj_ref, bproj_ref, o_ref, acc_ref):
    """Hidden (n_state) axis tiled as a reduction; f32 accumulator in VMEM."""
    k = pl.program_id(1)

    @pl.when(k == 0)
    def _():
        acc_ref[...] = jnp.zeros_like(acc_ref)

    # c_fc slab: (TILE_M, nx) @ (nx, TILE_H) -> f32, + b_fc slab, gelu in f32.
    h = jnp.dot(x_ref[...], wfc_ref[...],
                preferred_element_type=jnp.float32) + bfc_ref[...]
    h = _gelu(h)

    # c_proj partial: (TILE_M, TILE_H) @ (TILE_H, nx) accumulated in f32 scratch.
    acc_ref[...] += jnp.dot(h.astype(wproj_ref.dtype), wproj_ref[...],
                            preferred_element_type=jnp.float32)

    @pl.when(k == pl.num_programs(1) - 1)
    def _():
        # b_proj added exactly once, at finalize. Dropout: identity in eval mode.
        o_ref[...] = (acc_ref[...] + bproj_ref[...]).astype(o_ref.dtype)


# ---------------------------------------------------------------------------
# Wrapper
# ---------------------------------------------------------------------------

def mlp_forward(x, w_fc, b_fc, w_proj, b_proj, *,
                tile_m=None, tile_h=1024, weights_dtype=None, allow_resident=True):
    """x: (B, T, nx). Returns (B, T, nx) in x's original dtype."""
    B, T, nx = x.shape
    n_state = w_fc.shape[1]
    M = B * T
    out_dtype = x.dtype

    # Optional bf16 compute path: full-rate MXU on v5e/v6e/v7x and 2x less weight
    # traffic; accumulation stays f32 inside the kernel.
    if weights_dtype is not None:
        w_fc = w_fc.astype(weights_dtype)
        w_proj = w_proj.astype(weights_dtype)
        x = x.astype(weights_dtype)

    vmem_limit = _vmem_limit_bytes()
    if tile_m is None:
        # Bigger row tiles = bigger weight-reuse factor in the tiled path.
        tile_m = 512 if vmem_limit <= 48 * 1024 * 1024 else 1024

    # Lane-dense output: pad nx up to a multiple of 128.
    nx_p = _round_up(max(nx, 128), 128)
    ns_128 = _round_up(max(n_state, 128), 128)

    # Row tiling: clamp to the problem, but keep >= 2 tiles when possible so the
    # "parallel" axis can shard across both TensorCores on v7x.
    m8 = _round_up(max(M, 1), 8)
    tile_m = min(tile_m, m8)
    if tile_m == m8 and m8 >= 16:
        tile_m = _round_up(m8 // 2, 8)
    M_p = _round_up(M, tile_m)

    x_item = jnp.dtype(x.dtype).itemsize
    w_item = jnp.dtype(w_fc.dtype).itemsize

    # --- choose path: weights resident in VMEM vs hidden-dim-tiled reduction ----
    weight_bytes = 2 * nx_p * ns_128 * w_item
    stream_bytes = 2 * 2 * tile_m * nx_p * x_item        # x + out, double-buffered
    h_bytes = 2 * tile_m * ns_128 * 4                    # f32 gelu intermediate (+cast)
    resident_need = 2 * weight_bytes + stream_bytes + h_bytes + (4 << 20)
    use_resident = allow_resident and resident_need <= vmem_limit

    if use_resident:
        ns_p = ns_128
    else:
        tile_h = _round_up(min(tile_h, ns_128), 128)
        ns_p = _round_up(n_state, tile_h)

    # --- padding (no-ops skipped; weight pads should live at param init) --------
    x2d = x.reshape(M, nx)
    if M_p != M or nx_p != nx:
        x2d = jnp.pad(x2d, ((0, M_p - M), (0, nx_p - nx)))
    if nx_p != nx or ns_p != n_state:
        w_fc = jnp.pad(w_fc, ((0, nx_p - nx), (0, ns_p - n_state)))
        w_proj = jnp.pad(w_proj, ((0, ns_p - n_state), (0, nx_p - nx)))
    bfc = jnp.pad(b_fc, (0, ns_p - n_state)).reshape(1, ns_p)
    bproj = jnp.pad(b_proj, (0, nx_p - nx)).reshape(1, nx_p)

    cost = pl.CostEstimate(
        flops=4 * M * nx * n_state + 10 * M * n_state,
        transcendentals=M * n_state,
        bytes_accessed=(2 * M * nx * x_item
                        + 2 * nx * n_state * w_item
                        + (n_state + nx) * 4),
    )

    if use_resident:
        out2d = pl.pallas_call(
            _mlp_kernel_resident,
            out_shape=jax.ShapeDtypeStruct((M_p, nx_p), out_dtype),
            grid=(M_p // tile_m,),
            in_specs=[
                pl.BlockSpec((tile_m, nx_p), lambda i: (i, 0)),   # x rows (streamed)
                pl.BlockSpec((nx_p, ns_p), lambda i: (0, 0)),     # w_fc (resident)
                pl.BlockSpec((1, ns_p), lambda i: (0, 0)),        # b_fc (resident)
                pl.BlockSpec((ns_p, nx_p), lambda i: (0, 0)),     # w_proj (resident)
                pl.BlockSpec((1, nx_p), lambda i: (0, 0)),        # b_proj (resident)
            ],
            out_specs=pl.BlockSpec((tile_m, nx_p), lambda i: (i, 0)),
            compiler_params=pltpu.CompilerParams(
                dimension_semantics=("parallel",),
                vmem_limit_bytes=vmem_limit,
            ),
            cost_estimate=cost,
        )(x2d, w_fc, bfc, w_proj, bproj)
    else:
        out2d = pl.pallas_call(
            _mlp_kernel_tiled,
            out_shape=jax.ShapeDtypeStruct((M_p, nx_p), out_dtype),
            grid=(M_p // tile_m, ns_p // tile_h),
            in_specs=[
                pl.BlockSpec((tile_m, nx_p), lambda i, k: (i, 0)),   # x rows
                pl.BlockSpec((nx_p, tile_h), lambda i, k: (0, k)),   # w_fc hidden slab
                pl.BlockSpec((1, tile_h), lambda i, k: (0, k)),      # b_fc hidden slab
                pl.BlockSpec((tile_h, nx_p), lambda i, k: (k, 0)),   # w_proj hidden slab
                pl.BlockSpec((1, nx_p), lambda i, k: (0, 0)),        # b_proj (resident)
            ],
            out_specs=pl.BlockSpec((tile_m, nx_p), lambda i, k: (i, 0)),
            scratch_shapes=[pltpu.VMEM((tile_m, nx_p), jnp.float32)],
            compiler_params=pltpu.CompilerParams(
                dimension_semantics=("parallel", "arbitrary"),
                vmem_limit_bytes=vmem_limit,
            ),
            cost_estimate=cost,
        )(x2d, w_fc, bfc, w_proj, bproj)

    return out2d[:M, :nx].reshape(B, T, nx).astype(out_dtype)


def mlp_reference(x, w_fc, b_fc, w_proj, b_proj):
    h = _gelu(jnp.einsum("btc,cf->btf", x, w_fc) + b_fc)
    return jnp.einsum("btf,fc->btc", h, w_proj) + b_proj


if __name__ == "__main__":
    key = jax.random.PRNGKey(0)
    B, T = 2, 8
    nx = 32          # cfg.n_embd
    n_state = 256    # hidden width of the MLP

    kx, kw1, kw2 = jax.random.split(key, 3)
    x = jax.random.normal(kx, (B, T, nx), dtype=jnp.float32)
    # Conv1D(rf=1) params: w ~ N(0, 0.02), b = 0
    w_fc = 0.02 * jax.random.normal(kw1, (nx, n_state), dtype=jnp.float32)
    b_fc = jnp.zeros((n_state,), dtype=jnp.float32)
    w_proj = 0.02 * jax.random.normal(kw2, (n_state, nx), dtype=jnp.float32)
    b_proj = jnp.zeros((nx,), dtype=jnp.float32)

    ref = mlp_reference(x, w_fc, b_fc, w_proj, b_proj)

    # 1) Weights-resident fast path (the common case for transformer MLPs).
    out = jax.block_until_ready(mlp_forward(x, w_fc, b_fc, w_proj, b_proj))
    assert out.shape == (B, T, nx)
    assert jnp.allclose(out, ref, atol=1e-5, rtol=1e-5)

    # 2) Hidden-dim-tiled reduction path (used when the weights exceed VMEM).
    out_t = jax.block_until_ready(
        mlp_forward(x, w_fc, b_fc, w_proj, b_proj, allow_resident=False, tile_h=128))
    assert jnp.allclose(out_t, ref, atol=1e-5, rtol=1e-5)

    # 3) bf16-weight path (full-rate MXU on v5e/v6e/v7x); f32 accumulation in-kernel.
    out_bf = jax.block_until_ready(
        mlp_forward(x, w_fc, b_fc, w_proj, b_proj, weights_dtype=jnp.bfloat16))
    assert jnp.allclose(out_bf, ref, atol=5e-3, rtol=5e-2)

    print("KERNEL_OK")
</pallas_src>

<mosaic_0001>
module attributes {stable_mosaic.version = 11 : i64} {
  func.func @_mlp_kernel_resident(%arg0: i32, %arg1: memref<8x128xf32, #tpu.memory_space<vmem>>, %arg2: memref<128x256xf32, #tpu.memory_space<vmem>>, %arg3: memref<1x256xf32, #tpu.memory_space<vmem>>, %arg4: memref<256x128xf32, #tpu.memory_space<vmem>>, %arg5: memref<1x128xf32, #tpu.memory_space<vmem>>, %arg6: memref<8x128xf32, #tpu.memory_space<vmem>>) attributes {dimension_semantics = [#tpu.dimension_semantics<parallel>], iteration_bounds = array<i64: 2>, scalar_prefetch = 0 : i64, scratch_operands = 0 : i64, tpu.core_type = #tpu.core_type<tc>, window_params = [{transform_indices = @transform_0, window_bounds = array<i64: 8, 128>}, {pipeline_mode = #tpu.pipeline_mode<synchronous>, transform_indices = @transform_1, window_bounds = array<i64: 128, 256>}, {pipeline_mode = #tpu.pipeline_mode<synchronous>, transform_indices = @transform_2, window_bounds = array<i64: 1, 256>}, {pipeline_mode = #tpu.pipeline_mode<synchronous>, transform_indices = @transform_3, window_bounds = array<i64: 256, 128>}, {pipeline_mode = #tpu.pipeline_mode<synchronous>, transform_indices = @transform_4, window_bounds = array<i64: 1, 128>}, {transform_indices = @transform_5, window_bounds = array<i64: 8, 128>}]} {
    %c0 = arith.constant 0 : index
    %c0_0 = arith.constant 0 : index
    %0 = vector.load %arg1[%c0, %c0_0] : memref<8x128xf32, #tpu.memory_space<vmem>>, vector<8x128xf32>
    %c0_1 = arith.constant 0 : index
    %c0_2 = arith.constant 0 : index
    %1 = vector.load %arg2[%c0_1, %c0_2] : memref<128x256xf32, #tpu.memory_space<vmem>>, vector<128x256xf32>
    %cst = arith.constant dense<0.000000e+00> : vector<8x256xf32>
    %2 = tpu.matmul %0, %1, %cst {dimension_numbers = #tpu.dot_dimension_numbers<[1], [0], [0], [1], [0, 0, 1, 1], [], []>} : vector<8x128xf32>, vector<128x256xf32>, vector<8x256xf32> -> vector<8x256xf32>
    %c0_3 = arith.constant 0 : index
    %c0_4 = arith.constant 0 : index
    %3 = vector.load %arg3[%c0_3, %c0_4] : memref<1x256xf32, #tpu.memory_space<vmem>>, vector<1x256xf32>
    %4 = vector.broadcast %3 : vector<1x256xf32> to vector<8x256xf32>
    %5 = arith.addf %2, %4 : vector<8x256xf32>
    %cst_5 = arith.constant 5.000000e-01 : f32
    %6 = vector.broadcast %cst_5 : f32 to vector<8x256xf32>
    %7 = arith.mulf %6, %5 : vector<8x256xf32>
    %cst_6 = arith.constant 4.471500e-02 : f32
    %8 = vector.broadcast %cst_6 : f32 to vector<8x256xf32>
    %9 = arith.mulf %8, %5 : vector<8x256xf32>
    %10 = arith.mulf %9, %5 : vector<8x256xf32>
    %11 = arith.mulf %10, %5 : vector<8x256xf32>
    %12 = arith.addf %5, %11 : vector<8x256xf32>
    %cst_7 = arith.constant 0.797884583 : f32
    %13 = vector.broadcast %cst_7 : f32 to vector<8x256xf32>
    %14 = arith.mulf %13, %12 : vector<8x256xf32>
    %15 = math.tanh %14 : vector<8x256xf32>
    %cst_8 = arith.constant 1.000000e+00 : f32
    %16 = vector.broadcast %cst_8 : f32 to vector<8x256xf32>
    %17 = arith.addf %16, %15 : vector<8x256xf32>
    %18 = arith.mulf %7, %17 : vector<8x256xf32>
    %c0_9 = arith.constant 0 : index
    %c0_10 = arith.constant 0 : index
    %19 = vector.load %arg4[%c0_9, %c0_10] : memref<256x128xf32, #tpu.memory_space<vmem>>, vector<256x128xf32>
    %cst_11 = arith.constant dense<0.000000e+00> : vector<8x128xf32>
    %20 = tpu.matmul %18, %19, %cst_11 {dimension_numbers = #tpu.dot_dimension_numbers<[1], [0], [0], [1], [0, 0, 1, 1], [], []>} : vector<8x256xf32>, vector<256x128xf32>, vector<8x128xf32> -> vector<8x128xf32>
    %c0_12 = arith.constant 0 : index
    %c0_13 = arith.constant 0 : index
    %21 = vector.load %arg5[%c0_12, %c0_13] : memref<1x128xf32, #tpu.memory_space<vmem>>, vector<1x128xf32>
    %22 = vector.broadcast %21 : vector<1x128xf32> to vector<8x128xf32>
    %23 = arith.addf %20, %22 : vector<8x128xf32>
    %c0_14 = arith.constant 0 : index
    %c0_15 = arith.constant 0 : index
    %24 = vector.load %arg6[%c0_14, %c0_15] : memref<8x128xf32, #tpu.memory_space<vmem>>, vector<8x128xf32>
    tpu.vector_store %arg6[%c0_14, %c0_15], %23 {strides = array<i32>} : memref<8x128xf32, #tpu.memory_space<vmem>>, vector<8x128xf32>,
    return
  }
  func.func @transform_0(%arg0: i32) -> (i32, i32) {
    %c0_i32 = arith.constant 0 : i32
    %c0_i32_0 = arith.constant 0 : i32
    return %arg0, %c0_i32 : i32, i32
  }
  func.func @transform_1(%arg0: i32) -> (i32, i32) {
    %c0_i32 = arith.constant 0 : i32
    %c0_i32_0 = arith.constant 0 : i32
    %c0_i32_1 = arith.constant 0 : i32
    return %c0_i32, %c0_i32_0 : i32, i32
  }
  func.func @transform_2(%arg0: i32) -> (i32, i32) {
    %c0_i32 = arith.constant 0 : i32
    %c0_i32_0 = arith.constant 0 : i32
    %c0_i32_1 = arith.constant 0 : i32
    return %c0_i32, %c0_i32_0 : i32, i32
  }
  func.func @transform_3(%arg0: i32) -> (i32, i32) {
    %c0_i32 = arith.constant 0 : i32
    %c0_i32_0 = arith.constant 0 : i32
    %c0_i32_1 = arith.constant 0 : i32
    return %c0_i32, %c0_i32_0 : i32, i32
  }
  func.func @transform_4(%arg0: i32) -> (i32, i32) {
    %c0_i32 = arith.constant 0 : i32
    %c0_i32_0 = arith.constant 0 : i32
    %c0_i32_1 = arith.constant 0 : i32
    return %c0_i32, %c0_i32_0 : i32, i32
  }
  func.func @transform_5(%arg0: i32) -> (i32, i32) {
    %c0_i32 = arith.constant 0 : i32
    %c0_i32_0 = arith.constant 0 : i32
    return %arg0, %c0_i32 : i32, i32
  }
}

</mosaic_0001>

<bundles_post_ra>
// kernel: tpu_custom_call.1
= control target key start
LH: loop header
LB: loop body
LE: loop exit
PB: predicated region body
PF: predicated region fallthrough
CT: control target
= control target key end

     0   :  { %10 = vsyncpa [#allocation3], 0  ;;  %s1082_s0 = inlined_call_operand.hbm [shape: f32[16,128], index: 0, kind: input, shape index: {}]   ;;  %s1083_s1 = inlined_call_operand.hbm [shape: f32[128,256], index: 1, kind: input, shape index: {}]   ;;  %s1084_s2 = inlined_call_operand.hbm [shape: f32[1,256], index: 2, kind: input, shape index: {}]   ;;  %s1085_s3 = inlined_call_operand.hbm [shape: f32[256,128], index: 3, kind: input, shape index: {}]   ;;  %s1086_s4 = inlined_call_operand.vmem [shape: f32[1,128], index: 4, kind: input, shape index: {}]   ;;  %s1087_s5 = inlined_call_operand.hbm [shape: f32[16,128], index: 5, kind: output, shape index: {}]  }
   0x1   :  { %12 = vsyncpa [#allocation3 + $0x1], 0 }
   0x2   :  { %13 = vsyncpa [#allocation6], 0 }
   0x3   :  { %14 = vsyncpa [#allocation9], 0 }
   0x4   :  { %15 = vsyncpa [#allocation4], 0 }
   0x5   :  { %17 = vsyncpa [#allocation4 + $0x1], 0  ;;  %s916_s18 = smov 0   ;;  %s918_s19 = smov 0  }
   0x6   :  { %s920_s20 = smov 0   ;;  %s922_s21 = smov 0  }
   0x7 LB: > { %s175_s24 = sshll.u32 %s1083_s1, 4  ;;  %s940_s25 = sadd.s32 4294967295, %s877_s21   ;;  %s877_s21 = sphi %s922_s21, %s1098_s21   ;;  %s873_s20 = sphi %s920_s20, %s1097_s20   ;;  %s869_s19 = sphi %s918_s19, %s1096_s19   ;;  %s865_s18 = sphi %s916_s18, %s1095_s18   ;;  %s176_s24 = int_to_ptr.hbm [resolvable:$true] %s175_s24 }
   0x8   : > { %p580_p0 = scmp.ge.s32.totalorder %s877_s21, 1  ;;  %p44_p1 = scmp.eq.s32.totalorder %s940_s25, 0 }
   0x9   : > { %p164_p2 = scmp.lt.s32.totalorder %s877_s21, 3  ;;  %s879_s27 = smov [#allocation5]  }
   0xa   : > { %s177_s28 = sshll.u32 %s879_s27, 4  ;;  %s190_s6 = sshll.u32 %s1084_s2, 4  ;;  %s178_s28 = int_to_ptr.vmem [resolvable:$true] %s177_s28  ;;  %s191_s6 = int_to_ptr.hbm [resolvable:$true] %s190_s6 }
   0xb   : > { %p945_p3 = pnand %p580_p0, %p164_p2  ;;  %s201_s10 = sshll.u32 %s1085_s3, 4  ;;  %s202_s10 = int_to_ptr.hbm [resolvable:$true] %s201_s10 }
   0xc   : > { %s880_s11 = smov [#allocation7]   ;;  %s881_s13 = smov 256  }
   0xd   : > { %p613_p4 = pneg %p945_p3  ;;  %s192_s12 = sshll.u32 %s880_s11, 4  ;;  %s193_s12 = int_to_ptr.vmem [resolvable:$true] %s192_s12 }
   0xe   : > { %s882_s14 = smov 16   ;;  %s883_s15 = smov [#allocation8]  }
   0xf   : > { %p957_p6 = pnand %p613_p4, %p44_p1  ;;  %s203_s16 = sshll.u32 %s883_s15, 4  ;;  %s204_s16 = int_to_ptr.vmem [resolvable:$true] %s203_s16 }
  0x10   : > { %s884_s17 = smov 128   ;;  %s885_s22 = smov 8  }
  0x11   : > { %616 = dma.hbm_to_vmem [thread:$0]  (!%p957_p6), %s176_s24, 4096, %s178_s28, [#allocation6], %s881_s13, %s881_s13, %s882_s14  }
  0x12   : > { %619 = dma.hbm_to_vmem [thread:$0]  (!%p957_p6), %s191_s6, 32, %s193_s12, [#allocation6]  }
  0x13   : > { %622 = dma.hbm_to_vmem [thread:$0]  (!%p957_p6), %s202_s10, 4096, %s204_s16, [#allocation9], %s884_s17, %s884_s17, %s885_s22  }
  0x14   : > { %s579_s23 = sadd.s32 4294967294, %s877_s21   ;;  %s972_s24 = sadd.s32 1, %s877_s21  }
  0x15   : > { %s30_s27 = sadd.s32 1, %s873_s20  ;;  %s27_s28 = ssub.s32 %s877_s21, %s972_s24 }
  0x16   : > { %p37_p7 = scmp.ne.s32.totalorder %s873_s20, %s869_s19  ;;  %p28_p8 = scmp.eq.s32.totalorder %s27_s28, 0 }
  0x17   : > { %p38_p9 = scmp.eq.s32.totalorder %s877_s21, 0  ;;  %p43_p10 = scmp.ne.s32.totalorder %s869_s19, %s865_s18 }
  0x18   : > { %p151_p11 = scmp.eq.s32.totalorder %s940_s25, 1  ;;  %p157_p0 = scmp.eq.s32.totalorder %s579_s23, 1 }
  0x19   : > { %s984_s29 = scalar_select %p28_p8, %s873_s20, %s30_s27  }
  0x1a   : > { %p988_p12 = por %p44_p1, %p43_p10  ;;  %p992_p13 = por %p151_p11, %p37_p7 }
  0x1b   : > { %p39_p2 = por %p38_p9, %p37_p7  ;;  %s220_s7 = sand.u32 1, %s873_s20  }
  0x1c   : > { %p997_p4 = por %p157_p0, %p43_p10  ;;  %p634_p6 = scmp.lt.s32.totalorder %s877_s21, 2 }
  0x1d   : > { %s585_s9 = sshll.u32 %s220_s7, 3  ;;  %s586_s10 = sshll.u32 %s877_s21, 3 }
  0x1e   : > { %s228_s13 = scalar_lea.hbm %s1082_s0, %s586_s10  ;;  %s224_s15 = scalar_lea.vmem [#allocation2], %s585_s9 }
  0x1f   : > { %s230_s14 = sshll.u32 %s228_s13, 4  ;;  %s232_s16 = sshll.u32 %s224_s15, 4  ;;  %s231_s14 = int_to_ptr.hbm [resolvable:$true] %s230_s14  ;;  %s233_s16 = int_to_ptr.vmem [resolvable:$true] %s232_s16 }
  0x20   : > { %p1006_p8 = pnand %p634_p6, %p39_p2  ;;  %s221_s22 = scalar_lea.sflag [#allocation3], %s220_s7 }
  0x21   : > { %s773_s23 = sshra.s32 %s231_s14, 4  ;;  %s780_s9 = scalar_lea.hbm %s1082_s0, 16  ;;  %s774_s23 = int_to_ptr.hbm [resolvable:$true] %s773_s23 }
  0x22   : > { %s775_s27 = scalar_lea.hbm %s774_s23, 8  ;;  %p777_p9 = pneg %p1006_p8 }
  0x23   : > { %p776_p7 = scmp.ne.s32.totalorder %s774_s23, %s775_s27  ;;  %p781_p0 = scmp.lt.s32.totalorder %s774_s23, %s1082_s0 }
  0x24   : > { %p782_p2 = scmp.lt.s32.totalorder %s780_s9, %s775_s27 }
  0x25   : > { %p778_p10 = pnand %p777_p9, %p776_p7 }
  0x26   : > { %p783_p6 = por %p782_p2, %p781_p0 }
  0x27   : > { %p779_p11 = pneg %p778_p10 }
  0x29   : > { %p784_p5 = pnand %p783_p6, %p779_p11 }
  0x2b   : > { %787 = shalt.err (!%p784_p5)
}
  0x2c   : > { %626 = dma.hbm_to_vmem [thread:$0]  (!%p1006_p8), %s231_s14, 128, %s233_s16, %s221_s22  }
  0x2d   : > { %241 = sbr.rel (%p945_p3) target bundleno = 375 (0x177), region = 40  ;;  %s1023_s7 = sand.u32 (!%p945_p3), 1, %s869_s19  }
  0x2e   : > { %s588_s13 = sshll.u32 (!%p945_p3), %s1023_s7, 3  ;;  %s244_s15 = scalar_lea.sflag (!%p945_p3), [#allocation3], %s1023_s7 }
  0x2f   : > { %s1029_s23 = scalar_lea.vmem (!%p945_p3), [#allocation2], %s588_s13 }
  0x32   : > { %848 = dma.done.wait (%p988_p12), %s244_s15, 128  }
  0x33   : > { %850 = vsyncadd (%p988_p12), %s244_s15, 4294967168 }
  0x34   : > { %852 = dma.done.wait (%p44_p1), [#allocation6], 4128  }
  0x35   : > { %854 = vsyncadd (%p44_p1), [#allocation6], 4294963168 }
  0x36   : > { %856 = dma.done.wait (%p44_p1), [#allocation9], 4096  }
  0x37   : > { %858 = vsyncadd (%p44_p1), [#allocation9], 4294963200  ;;  %v321_v0 = vld [vmem:[#allocation5 + $0xf0] sm:$0xff]  ;;  %v322_v1 = vld [vmem:[#allocation5 + $0xf8] sm:$0xff]  ;;  %s594_s26 = sshll.u32 %s940_s25, 3  ;;  %s289_s27 = scalar_lea.vmem [#allocation10], %s588_s13 }
  0x38   : > { %v319_v2 = vld [vmem:[#allocation5 + $0xe0] sm:$0xff]  ;;  %329 = vmatpush.msra.mxu0 %v321_v0  ;;  %349 = vmatpush.msra.mxu1 %v322_v1  ;;  %v320_v3 = vld [vmem:[#allocation5 + $0xe8] sm:$0xff]  ;;  %v317_v4 = vld [vmem:[#allocation5 + $0xd0] sm:$0xff]  ;;  %s475_s22 = scalar_lea.hbm %s1087_s5, %s594_s26  ;;  %s477_s28 = sshll.u32 %s289_s27, 4  ;;  %s478_s28 = int_to_ptr.vmem [resolvable:$true] %s477_s28 }
  0x39   : > { %v318_v5 = vld [vmem:[#allocation5 + $0xd8] sm:$0xff]  ;;  %v315_v6 = vld [vmem:[#allocation5 + $0xc0] sm:$0xff]  ;;  %v316_v7 = vld [vmem:[#allocation5 + $0xc8] sm:$0xff]  ;;  %s479_s10 = sshll.u32 %s475_s22, 4  ;;  %s465_s25 = scalar_lea.sflag [#allocation4], %s1023_s7  ;;  %s480_s10 = int_to_ptr.hbm [resolvable:$true] %s479_s10 }
  0x3a   : > { %330 = vmatpush.msra.mxu0 %v319_v2  ;;  %350 = vmatpush.msra.mxu1 %v320_v3  ;;  %v313_v8 = vld [vmem:[#allocation5 + $0xb0] sm:$0xff]  ;;  %v314_v9 = vld [vmem:[#allocation5 + $0xb8] sm:$0xff]  ;;  %v311_v10 = vld [vmem:[#allocation5 + $0xa0] sm:$0xff]  ;;  %s817_s9 = sshra.s32 %s480_s10, 4  ;;  %s823_s13 = scalar_lea.hbm %s1087_s5, 16  ;;  %s818_s9 = int_to_ptr.hbm [resolvable:$true] %s817_s9 }
  0x3b   : > { %v312_v11 = vld [vmem:[#allocation5 + $0xa8] sm:$0xff]  ;;  %v309_v12 = vld [vmem:[#allocation5 + $0x90] sm:$0xff]  ;;  %v310_v13 = vld [vmem:[#allocation5 + $0x98] sm:$0xff]  ;;  %s819_s11 = scalar_lea.hbm %s818_s9, 8  ;;  %p824_p12 = scmp.lt.s32.totalorder %s818_s9, %s1087_s5 }
  0x3c   : > { %331 = vmatpush.msra.mxu0 %v317_v4  ;;  %351 = vmatpush.msra.mxu1 %v318_v5  ;;  %v402_v14 = vld [vmem:[#allocation8 + $0x78] sm:$0xff]  ;;  %v401_v16 = vld [vmem:[#allocation8 + $0x70] sm:$0xff]  ;;  %v308_v18 = vld [vmem:[#allocation5 + $0x88] sm:$0xff]  ;;  %p820_p1 = scmp.ne.s32.totalorder %s818_s9, %s819_s11  ;;  %p825_p8 = scmp.lt.s32.totalorder %s823_s13, %s819_s11 }
  0x3d   : > { %v418_v15 = vld [vmem:[#allocation8 + $0xf8] sm:$0xff]  ;;  %423 = vmatpush.msra.mxu2 %v402_v14  ;;  %v417_v19 = vld [vmem:[#allocation8 + $0xf0] sm:$0xff]  ;;  %v400_v20 = vld [vmem:[#allocation8 + $0x68] sm:$0xff] }
  0x3e   : > { %332 = vmatpush.msra.mxu0 %v315_v6  ;;  %352 = vmatpush.msra.mxu1 %v316_v7  ;;  %v307_v17 = vld [vmem:[#allocation5 + $0x80] sm:$0xff]  ;;  %v416_v21 = vld [vmem:[#allocation8 + $0xe8] sm:$0xff]  ;;  %v306_v23 = vld [vmem:[#allocation5 + $0x78] sm:$0xff]  ;;  %p821_p3 = pnand %p820_p1, %p992_p13  ;;  %p826_p7 = por %p825_p8, %p824_p12 }
  0x3f   : > { %443 = vmatpush.msra.mxu3 %v418_v15  ;;  %v305_v22 = vld [vmem:[#allocation5 + $0x70] sm:$0xff]  ;;  %424 = vmatpush.msra.mxu2 %v401_v16  ;;  %v399_v24 = vld [vmem:[#allocation8 + $0x60] sm:$0xff]  ;;  %v302_v29 = vld [vmem:[#allocation5 + $0x58] sm:$0xff] }
  0x40   : > { %333 = vmatpush.msra.mxu0 %v313_v8  ;;  %353 = vmatpush.msra.mxu1 %v314_v9  ;;  %v415_v25 = vld [vmem:[#allocation8 + $0xe0] sm:$0xff]  ;;  %v301_v28 = vld [vmem:[#allocation5 + $0x50] sm:$0xff]  ;;  %v298_v33 = vld [vmem:[#allocation5 + $0x38] sm:$0xff]  ;;  %p822_p5 = pneg %p821_p3 }
  0x41   : > { %444 = vmatpush.msra.mxu3 %v417_v19  ;;  %v303_v26 = vld [vmem:[#allocation5 + $0x60] sm:$0xff]  ;;  %v304_v27 = vld [vmem:[#allocation5 + $0x68] sm:$0xff]  ;;  %425 = vmatpush.msra.mxu2 %v400_v20  ;;  %v297_v32 = vld [vmem:[#allocation5 + $0x30] sm:$0xff] }
  0x42   : > { %334 = vmatpush.msra.mxu0 %v311_v10  ;;  %354 = vmatpush.msra.mxu1 %v312_v11  ;;  %v299_v30 = vld [vmem:[#allocation5 + $0x40] sm:$0xff]  ;;  %v300_v31 = vld [vmem:[#allocation5 + $0x48] sm:$0xff]  ;;  %v293_v36 = vld [vmem:[#allocation5 + $0x10] sm:$0xff]  ;;  %p827_p9 = pnand %p826_p7, %p822_p5 }
  0x43   : > { %445 = vmatpush.msra.mxu3 %v416_v21  ;;  %426 = vmatpush.msra.mxu2 %v399_v24  ;;  %v295_v34 = vld [vmem:[#allocation5 + $0x20] sm:$0xff]  ;;  %v296_v35 = vld [vmem:[#allocation5 + $0x28] sm:$0xff]  ;;  %v294_v37 = vld [vmem:[#allocation5 + $0x18] sm:$0xff] }
  0x44   : > { %335 = vmatpush.msra.mxu0 %v309_v12  ;;  %355 = vmatpush.msra.mxu1 %v310_v13  ;;  %v291_v38 = vld [vmem:[#allocation5] sm:$0xff]  ;;  %v292_v39 = vld [vmem:[#allocation5 + $0x8] sm:$0xff]  ;;  %v290_v40 = vld [vmem:[%s1029_s23] sm:$0xff] }
  0x45   : > { %446 = vmatpush.msra.mxu3 %v415_v25  ;;  %v398_v41 = vld [vmem:[#allocation8 + $0x58] sm:$0xff]  ;;  %v397_v43 = vld [vmem:[#allocation8 + $0x50] sm:$0xff]  ;;  %v396_v45 = vld [vmem:[#allocation8 + $0x48] sm:$0xff] }
  0x46   : > { %336 = vmatpush.msra.mxu0 %v307_v17  ;;  %356 = vmatpush.msra.mxu1 %v308_v18  ;;  %v414_v42 = vld [vmem:[#allocation8 + $0xd8] sm:$0xff]  ;;  %v413_v44 = vld [vmem:[#allocation8 + $0xd0] sm:$0xff]  ;;  %v412_v46 = vld [vmem:[#allocation8 + $0xc8] sm:$0xff] }
  0x47   : > { %427 = vmatpush.msra.mxu2 %v398_v41  ;;  %447 = vmatpush.msra.mxu3 %v414_v42  ;;  %v395_v47 = vld [vmem:[#allocation8 + $0x40] sm:$0xff]  ;;  %v394_v49 = vld [vmem:[#allocation8 + $0x38] sm:$0xff]  ;;  %v393_v51 = vld [vmem:[#allocation8 + $0x30] sm:$0xff] }
  0x48   : > { %337 = vmatpush.msra.mxu0 %v305_v22  ;;  %357 = vmatpush.msra.mxu1 %v306_v23  ;;  %v411_v48 = vld [vmem:[#allocation8 + $0xc0] sm:$0xff]  ;;  %v410_v50 = vld [vmem:[#allocation8 + $0xb8] sm:$0xff]  ;;  %v409_v52 = vld [vmem:[#allocation8 + $0xb0] sm:$0xff] }
  0x49   : > { %428 = vmatpush.msra.mxu2 %v397_v43  ;;  %448 = vmatpush.msra.mxu3 %v413_v44  ;;  %v392_v53 = vld [vmem:[#allocation8 + $0x28] sm:$0xff]  ;;  %v391_v55 = vld [vmem:[#allocation8 + $0x20] sm:$0xff]  ;;  %v390_v57 = vld [vmem:[#allocation8 + $0x18] sm:$0xff] }
  0x4a   : > { %338 = vmatpush.msra.mxu0 %v303_v26  ;;  %358 = vmatpush.msra.mxu1 %v304_v27  ;;  %v408_v54 = vld [vmem:[#allocation8 + $0xa8] sm:$0xff]  ;;  %v407_v56 = vld [vmem:[#allocation8 + $0xa0] sm:$0xff]  ;;  %v406_v58 = vld [vmem:[#allocation8 + $0x98] sm:$0xff] }
  0x4b   : > { %429 = vmatpush.msra.mxu2 %v396_v45  ;;  %449 = vmatpush.msra.mxu3 %v412_v46  ;;  %v389_v59 = vld [vmem:[#allocation8 + $0x10] sm:$0xff]  ;;  %v388_v61 = vld [vmem:[#allocation8 + $0x8] sm:$0xff]  ;;  %v387_v63 = vld [vmem:[#allocation8] sm:$0xff] }
  0x4c   : > { %339 = vmatpush.msra.mxu0 %v301_v28  ;;  %359 = vmatpush.msra.mxu1 %v302_v29  ;;  %v405_v60 = vld [vmem:[#allocation8 + $0x90] sm:$0xff]  ;;  %v404_v62 = vld [vmem:[#allocation8 + $0x88] sm:$0xff]  ;;  %v403_v0 = vld [vmem:[#allocation8 + $0x80] sm:$0xff] }
  0x4d   : > { %430 = vmatpush.msra.mxu2 %v395_v47  ;;  %450 = vmatpush.msra.mxu3 %v411_v48  ;;  %v323_v1 = vld [vmem:[#allocation7] sm:$0x3]  ;;  %v678_v26 = vld [vmem:[%s1086_s4] ss:$0 sm:$0xff] }
  0x4e   : > { %340 = vmatpush.msra.mxu0 %v299_v30  ;;  %360 = vmatpush.msra.mxu1 %v300_v31  ;;  %v325_v2 = vperm.slane %v323_v1, 0  ;;  %v326_v3 = vperm.slane %v323_v1, 1 }
  0x4f   : > { %431 = vmatpush.msra.mxu2 %v394_v49  ;;  %451 = vmatpush.msra.mxu3 %v410_v50 }
  0x50   : > { %341 = vmatpush.msra.mxu0 %v297_v32  ;;  %361 = vmatpush.msra.mxu1 %v298_v33 }
  0x51   : > { %432 = vmatpush.msra.mxu2 %v393_v51  ;;  %452 = vmatpush.msra.mxu3 %v409_v52 }
  0x52   : > { %342 = vmatpush.msra.mxu0 %v295_v34  ;;  %362 = vmatpush.msra.mxu1 %v296_v35 }
  0x53   : > { %433 = vmatpush.msra.mxu2 %v392_v53  ;;  %453 = vmatpush.msra.mxu3 %v408_v54 }
  0x54   : > { %343 = vmatpush.msra.mxu0 %v293_v36  ;;  %363 = vmatpush.msra.mxu1 %v294_v37 }
  0x55   : > { %434 = vmatpush.msra.mxu2 %v391_v55  ;;  %454 = vmatpush.msra.mxu3 %v407_v56 }
  0x56   : > { %344 = vmatpush.msra.mxu0 %v291_v38  ;;  %364 = vmatpush.msra.mxu1 %v292_v39 }
  0x57   : > { %345 = vmatmul.f32.vlgmr.msra.gmra.mxu0 %v290_v40  ;;  %365 = vmatmul.f32.vlgmr.msra.gmra.mxu1 %v290_v40 }
  0x58   : > { %435 = vmatpush.msra.mxu2 %v390_v57  ;;  %455 = vmatpush.msra.mxu3 %v406_v58 }
  0x5a   : > { %436 = vmatpush.msra.mxu2 %v389_v59  ;;  %456 = vmatpush.msra.mxu3 %v405_v60 }
  0x5c   : > { %437 = vmatpush.msra.mxu2 %v388_v61  ;;  %457 = vmatpush.msra.mxu3 %v404_v62 }
  0x5e   : > { %438 = vmatpush.msra.mxu2 %v387_v63  ;;  %458 = vmatpush.msra.mxu3 %v403_v0 }
  0xd4   : > { %v346_v4 = vpop.f32.mrf.mxu0  ;;  %v366_v5 = vpop.f32.mrf.mxu1 }
  0xd5   : > { %v347_v6 = vadd.f32 %v346_v4, %v325_v2  ;;  %v367_v7 = vadd.f32 %v366_v5, %v326_v3 }
  0xd7   : > { %v371_v8 = vmul.f32 0.044715, %v347_v6  ;;  %v372_v9 = vmul.f32 0.044715, %v367_v7  ;;  %v369_v20 = vmul.f32 0.5, %v347_v6  ;;  %v370_v22 = vmul.f32 0.5, %v367_v7 }
  0xd9   : > { %v373_v10 = vmul.f32 %v371_v8, %v347_v6  ;;  %v374_v11 = vmul.f32 %v372_v9, %v367_v7 }
  0xdb   : > { %v375_v12 = vmul.f32 %v373_v10, %v347_v6  ;;  %v376_v13 = vmul.f32 %v374_v11, %v367_v7 }
  0xdd   : > { %v377_v14 = vadd.f32 %v375_v12, %v347_v6  ;;  %v378_v15 = vadd.f32 %v376_v13, %v367_v7 }
  0xdf   : > { %v379_v16 = vmul.f32 0.7978846, %v377_v14  ;;  %v380_v17 = vmul.f32 0.7978846, %v378_v15 }
  0xe1   : > { %679 = vtanh.f32 %v379_v16 }
  0xe2   : > { %681 = vtanh.f32 %v380_v17 }
  0xe7   : > { %v680_v18 = vpop.eup %679 }
  0xe8   : > { %v682_v19 = vpop.eup %681  ;;  %v383_v21 = vadd.f32 1.0, %v680_v18 }
  0xe9   : > { %v384_v23 = vadd.f32 1.0, %v682_v19 }
  0xea   : > { %v385_v24 = vmul.f32 %v383_v21, %v369_v20 }
  0xeb   : > { %v386_v25 = vmul.f32 %v384_v23, %v370_v22 }
  0xec   : > { %439 = vmatmul.f32.vlgmr.msra.gmra.mxu2 %v385_v24 }
  0xed   : > { %459 = vmatmul.f32.vlgmr.msra.gmra.mxu3 %v386_v25 }
 0x16f   : > { %v440_v27 = vpop.f32.mrf.mxu2 }
 0x170   : > { %v441_v28 = vadd.f32 %v678_v26, %v440_v27  ;;  %v460_v29 = vpop.f32.mrf.mxu3 }
 0x172   : > { %v461_v30 = vadd.f32 %v460_v29, %v441_v28 }
 0x174   : > { %463 = vst [vmem:[%s289_s27] sm:$0xff] %v461_v30 }
 0x175   : > { %830 = shalt.err (!%p827_p9)
}
 0x176   : > { %611 = dma.vmem_to_hbm [thread:$0]  (%p992_p13), %s478_s28, 128, %s480_s10, %s465_s25  }
 0x177 PF: > { %s491_s7 = sand.u32 1, %s865_s18   ;;  %p1094_p10 = scmp.ge.s32.totalorder %s877_s21, 2 }
 0x178   : > { %s492_s30 = scalar_lea.sflag [#allocation4], %s491_s7 }
 0x179   : > { %p628_p11 = pnand %p1094_p10, %p997_p4 }
 0x17b   : > { %p629_p0 = pneg %p628_p11 }
 0x17d   : > { %860 = dma.done.wait (%p629_p0), %s492_s30, 128  }
 0x17e   : > { %862 = vsyncadd (%p629_p0), %s492_s30, 4294967168  ;;  %p20_p2 = scmp.ge.s32.totalorder %s972_s24, 4   ;;  %s1095_s18 = smov %s869_s19 }
 0x17f   : > { %s1096_s19 = smov %s873_s20  ;;  %s1097_s20 = smov %s984_s29 }
 0x180   : > { %s1098_s21 = smov %s972_s24  ;;  %22 = sbr.rel (!%p20_p2) target bundleno = 7 (0x7), region = 97 }
 0x185   :  { %498 = vsyncpa [#allocation3], 1 }
 0x186   :  { %500 = vsyncpa [#allocation3 + $0x1], 1 }
 0x187   :  { %501 = vsyncpa [#allocation6], 1 }
 0x188   :  { %502 = vsyncpa [#allocation9], 1 }
 0x189   :  { %503 = vsyncpa [#allocation4], 1 }
 0x18a   :  { %505 = vsyncpa [#allocation4 + $0x1], 1 }

</bundles_post_ra>
